<compile_context>
chip_gen: v6e
topology: v6e:2x2x1
jax: 0.10.0
libtpu: 0.0.40
codegen_flags: <defaults>
</compile_context>

<pallas_src>
import jax
import jax.numpy as jnp
from jax.experimental import pallas as pl
from jax.experimental.pallas import tpu as pltpu


def _smooth_punn_kernel(x_ref, w_ref, m_ref, b_ref, o_ref):
    # x_ref: (TB, I); w_ref: (I, O) = (weights**2).T; m_ref/b_ref: (1, O)
    log_x = jnp.log1p(x_ref[...])                                    # EUP
    act = jnp.dot(log_x, w_ref[...],
                  preferred_element_type=jnp.float32)                # MXU
    o_ref[...] = jnp.exp(act / m_ref[...] + b_ref[...])              # VPU + EUP


def _round_up(n, m):
    return ((n + m - 1) // m) * m


def _cdiv(a, b):
    return -(-a // b)


def _resident_spec(block_shape, index_map):
    """Grid-invariant parameter block: single-buffer it when the API allows."""
    try:
        return pl.BlockSpec(block_shape, index_map, pipeline_mode=pl.Buffered(1))
    except (TypeError, AttributeError):
        return pl.BlockSpec(block_shape, index_map)


def _choose_batch_tile(B, I, O, tile_budget_bytes):
    i_vmem = _round_up(I, 128)            # x tile is lane-padded in VMEM when I < 128
    o_vmem = _round_up(O, 128)            # same for the out tile
    per_row = 2 * 4 * (i_vmem + o_vmem)   # double-buffered x + out tiles, f32
    tb_vmem = max(8, tile_budget_bytes // per_row)
    tb_split = max(8, _cdiv(B, 4))        # aim for >= ~4 grid steps when B allows
    tb = min(tb_vmem, tb_split)
    tb = max(8, (tb // 8) * 8)            # sublane-aligned
    tb = min(tb, _round_up(B, 8))         # never larger than the (rounded) batch
    return tb


def smooth_punn_forward(x, weights, biases):
    """x: (B, I) f32, weights: (O, I) f32, biases: (O,) f32 -> (B, O) f32."""
    B, I = x.shape
    O = weights.shape[0]

    # One-time parameter prep (tiny O*I work, off the per-tile hot path): square and
    # pre-transpose the weights; precompute the row means. The divide stays in-kernel
    # so rounding matches the reference exactly.
    w_sq_t = (weights.astype(jnp.float32) ** 2).T                    # (I, O)
    mean_sq = jnp.mean(w_sq_t, axis=0, keepdims=True)                # (1, O)
    b_row = biases.astype(jnp.float32).reshape(1, O)

    # ---- VMEM plan (conservative so it also fits v7x's 64 MiB physical VMEM) ----
    i_vmem = _round_up(I, 128)
    o_vmem = _round_up(O, 128)
    weight_vmem = _round_up(I, 8) * o_vmem * 4                       # single resident copy
    total_budget = 48 * 1024 * 1024
    tile_budget = max(4 * 1024 * 1024, total_budget - weight_vmem)
    # TODO(synk): for very large I*O (resident squared-weight block alone > ~48 MiB)
    # add a K/N tiling grid axis with a VMEM accumulator instead of keeping the whole
    # (I, O) block resident (and consider bf16 weights on v6e/v7x).

    TB = _choose_batch_tile(B, I, O, tile_budget)
    grid = (_cdiv(B, TB),)                                           # no x padding

    need = (weight_vmem * 2                       # headroom if double-buffer fallback
            + 2 * TB * (i_vmem + o_vmem) * 4      # x + out tiles, double-buffered
            + 4 * 8 * o_vmem * 4)                 # mean + bias rows (sublane-padded)
    vmem_limit = int(min(max(need + (2 << 20), 16 << 20), 64 << 20))

    out = pl.pallas_call(
        _smooth_punn_kernel,
        out_shape=jax.ShapeDtypeStruct((B, O), jnp.float32),
        grid_spec=pl.GridSpec(
            grid=grid,
            in_specs=[
                pl.BlockSpec((TB, I), lambda i: (i, 0)),    # x tile, pipelined over batch
                _resident_spec((I, O), lambda i: (0, 0)),   # (weights**2).T, VMEM-resident
                _resident_spec((1, O), lambda i: (0, 0)),   # mean(w^2) row
                _resident_spec((1, O), lambda i: (0, 0)),   # bias row
            ],
            out_specs=pl.BlockSpec((TB, O), lambda i: (i, 0)),
        ),
        compiler_params=pltpu.CompilerParams(
            dimension_semantics=("parallel",),               # shard batch tiles across TCs
            vmem_limit_bytes=vmem_limit),
    )(x, w_sq_t, mean_sq, b_row)

    return out


def smooth_punn_reference(x, weights, biases):
    log_x = jnp.log(x + 1.0)
    w_sq = weights ** 2
    mean_sq = jnp.mean(w_sq, axis=1)
    act = (log_x @ w_sq.T) / mean_sq[None, :]
    return jnp.exp(act + biases[None, :])


if __name__ == "__main__":
    # Small shapes consistent with the module: batch=8, input_dim=32, output_dim=16.
    B, IN_DIM, OUT_DIM = 8, 32, 16

    key = jax.random.PRNGKey(0)
    kx, kw, kb = jax.random.split(key, 3)

    # Keep x + 1 > 0 for the log, as in typical PUNN usage.
    x = jax.random.uniform(kx, (B, IN_DIM), dtype=jnp.float32, minval=0.0, maxval=2.0)
    weights = jax.random.normal(kw, (OUT_DIM, IN_DIM), dtype=jnp.float32)
    biases = jax.random.normal(kb, (OUT_DIM,), dtype=jnp.float32)

    out = jax.block_until_ready(smooth_punn_forward(x, weights, biases))
    ref = jax.block_until_ready(smooth_punn_reference(x, weights, biases))

    assert out.shape == (B, OUT_DIM)
    # exp() amplifies small MXU-vs-XLA f32 contraction rounding diffs by |activation|,
    # hence the mildly relaxed rtol.
    assert jnp.allclose(out, ref, rtol=1e-4, atol=1e-5), "mismatch vs reference"
    print("KERNEL_OK")
</pallas_src>

<mosaic_0001>
module attributes {stable_mosaic.version = 11 : i64} {
  func.func @_smooth_punn_kernel(%arg0: i32, %arg1: memref<8x32xf32, #tpu.memory_space<vmem>>, %arg2: memref<32x16xf32, #tpu.memory_space<vmem>>, %arg3: memref<1x16xf32, #tpu.memory_space<vmem>>, %arg4: memref<1x16xf32, #tpu.memory_space<vmem>>, %arg5: memref<8x16xf32, #tpu.memory_space<vmem>>) attributes {dimension_semantics = [#tpu.dimension_semantics<parallel>], iteration_bounds = array<i64: 1>, scalar_prefetch = 0 : i64, scratch_operands = 0 : i64, tpu.core_type = #tpu.core_type<tc>, window_params = [{transform_indices = @transform_0, window_bounds = array<i64: 8, 32>}, {pipeline_mode = #tpu.pipeline_mode<synchronous>, transform_indices = @transform_1, window_bounds = array<i64: 32, 16>}, {pipeline_mode = #tpu.pipeline_mode<synchronous>, transform_indices = @transform_2, window_bounds = array<i64: 1, 16>}, {pipeline_mode = #tpu.pipeline_mode<synchronous>, transform_indices = @transform_3, window_bounds = array<i64: 1, 16>}, {transform_indices = @transform_4, window_bounds = array<i64: 8, 16>}]} {
    %c0 = arith.constant 0 : index
    %c0_0 = arith.constant 0 : index
    %0 = vector.load %arg1[%c0, %c0_0] : memref<8x32xf32, #tpu.memory_space<vmem>>, vector<8x32xf32>
    %1 = math.log1p %0 : vector<8x32xf32>
    %c0_1 = arith.constant 0 : index
    %c0_2 = arith.constant 0 : index
    %2 = vector.load %arg2[%c0_1, %c0_2] : memref<32x16xf32, #tpu.memory_space<vmem>>, vector<32x16xf32>
    %cst = arith.constant dense<0.000000e+00> : vector<8x16xf32>
    %3 = tpu.matmul %1, %2, %cst {dimension_numbers = #tpu.dot_dimension_numbers<[1], [0], [0], [1], [0, 0, 1, 1], [], []>} : vector<8x32xf32>, vector<32x16xf32>, vector<8x16xf32> -> vector<8x16xf32>
    %c0_3 = arith.constant 0 : index
    %c0_4 = arith.constant 0 : index
    %4 = vector.load %arg3[%c0_3, %c0_4] : memref<1x16xf32, #tpu.memory_space<vmem>>, vector<1x16xf32>
    %5 = vector.broadcast %4 : vector<1x16xf32> to vector<8x16xf32>
    %6 = arith.divf %3, %5 : vector<8x16xf32>
    %c0_5 = arith.constant 0 : index
    %c0_6 = arith.constant 0 : index
    %7 = vector.load %arg4[%c0_5, %c0_6] : memref<1x16xf32, #tpu.memory_space<vmem>>, vector<1x16xf32>
    %8 = vector.broadcast %7 : vector<1x16xf32> to vector<8x16xf32>
    %9 = arith.addf %6, %8 : vector<8x16xf32>
    %10 = math.exp %9 : vector<8x16xf32>
    %c0_7 = arith.constant 0 : index
    %c0_8 = arith.constant 0 : index
    %11 = vector.load %arg5[%c0_7, %c0_8] : memref<8x16xf32, #tpu.memory_space<vmem>>, vector<8x16xf32>
    tpu.vector_store %arg5[%c0_7, %c0_8], %10 {strides = array<i32>} : memref<8x16xf32, #tpu.memory_space<vmem>>, vector<8x16xf32>,
    return
  }
  func.func @transform_0(%arg0: i32) -> (i32, i32) {
    %c0_i32 = arith.constant 0 : i32
    %c0_i32_0 = arith.constant 0 : i32
    return %arg0, %c0_i32 : i32, i32
  }
  func.func @transform_1(%arg0: i32) -> (i32, i32) {
    %c0_i32 = arith.constant 0 : i32
    %c0_i32_0 = arith.constant 0 : i32
    %c0_i32_1 = arith.constant 0 : i32
    return %c0_i32, %c0_i32_0 : i32, i32
  }
  func.func @transform_2(%arg0: i32) -> (i32, i32) {
    %c0_i32 = arith.constant 0 : i32
    %c0_i32_0 = arith.constant 0 : i32
    %c0_i32_1 = arith.constant 0 : i32
    return %c0_i32, %c0_i32_0 : i32, i32
  }
  func.func @transform_3(%arg0: i32) -> (i32, i32) {
    %c0_i32 = arith.constant 0 : i32
    %c0_i32_0 = arith.constant 0 : i32
    %c0_i32_1 = arith.constant 0 : i32
    return %c0_i32, %c0_i32_0 : i32, i32
  }
  func.func @transform_4(%arg0: i32) -> (i32, i32) {
    %c0_i32 = arith.constant 0 : i32
    %c0_i32_0 = arith.constant 0 : i32
    return %arg0, %c0_i32 : i32, i32
  }
}

</mosaic_0001>

<bundles_post_ra>
// kernel: tpu_custom_call.1
= control target key start
LH: loop header
LB: loop body
LE: loop exit
PB: predicated region body
PF: predicated region fallthrough
CT: control target
= control target key end

     0   :  { %v191_v1 = vmov 0.0   ;;  %vm192_vm0 = vmmov 0   ;;  %s243_s0 = inlined_call_operand.vmem [shape: f32[8,32], index: 0, kind: input, shape index: {}]   ;;  %s244_s1 = inlined_call_operand.vmem [shape: f32[32,16], index: 1, kind: input, shape index: {}]   ;;  %s245_s2 = inlined_call_operand.vmem [shape: f32[1,16], index: 2, kind: input, shape index: {}]   ;;  %s246_s3 = inlined_call_operand.vmem [shape: f32[1,16], index: 3, kind: input, shape index: {}]   ;;  %s247_s4 = inlined_call_operand.hbm [shape: f32[8,16], index: 4, kind: output, shape index: {}]  }
   0x1   :  { %v31_v0 = vld [vmem:[%s244_s1 + $0x18] sm:$0xff]  ;;  %149 = vmatprep.subr.mxu0 %v191_v1  ;;  %v30_v2 = vld [vmem:[%s244_s1 + $0x10] sm:$0xff]  ;;  %157 = vmatprep.mubr.msk.f32.mxu0 %vm192_vm0, %v191_v1  ;;  %v18_v3 = vld [vmem:[%s243_s0] sm:$0xff] }
   0x2   :  { %9 = vsyncpa [#allocation3], 0  ;;  %150 = vmatpush3.msra.mxu0 %v31_v0  ;;  %v19_v4 = vadd.f32 1.0, %v18_v3  ;;  %v29_v5 = vld [vmem:[%s244_s1 + $0x8] sm:$0xff]  ;;  %v28_v6 = vld [vmem:[%s244_s1] sm:$0xff]  ;;  %v22_v7 = vmul.f32 -0.5, %v18_v3 }
   0x3   :  { %151 = vmatprep.subr.mxu0 %v191_v1  ;;  %v25_v9 = vand.u32 2147483647, %v18_v3  ;;  %vm32_vm2 = vcmask 261120   ;;  %v142_v14 = vld [vmem:[%s245_s2] ss:$0 sm:$0xff]  ;;  %s193_s27 = smov [#allocation2]  }
   0x4   :  { %152 = vmatpush3.msra.mxu0 %v30_v2  ;;  %163 = vlog2.f32 %v19_v4  ;;  %v23_v8 = vadd.f32 1.0, %v22_v7  ;;  %v143_v17 = vld [vmem:[%s246_s3] ss:$0 sm:$0xff]  ;;  %s133_s28 = sshll.u32 %s193_s27, 4  ;;  %vm125_vm3 = vcmask 130048   ;;  %s134_s28 = int_to_ptr.vmem [resolvable:$true] %s133_s28 }
   0x5   :  { %153 = vmatprep.subr.mxu0 %v191_v1  ;;  %vm26_vm1 = vcmp.lt.f32.partialorder %v25_v9, 0.0004427343  ;;  %165 = vrcp.f32 %v142_v14  ;;  %s169_s29 = scalar_lea.vmem %s134_s28, 128  ;;  %p174_p1 = scmp.lt.s32.totalorder %s134_s28, %s134_s28 }
   0x6   :  { %154 = vmatpush3.msra.mxu0 %v29_v5  ;;  %v24_v10 = vmul.f32 %v23_v8, %v18_v3  ;;  %p170_p0 = scmp.ne.s32.totalorder %s134_s28, %s169_s29  ;;  %p175_p2 = scmp.lt.s32.totalorder %s169_s29, %s169_s29 }
   0x7   :  { %155 = vmatprep.subr.mxu0 %v191_v1 }
   0x8   :  { %156 = vmatpush3.msra.mxu0 %v28_v6  ;;  %p176_p3 = por %p175_p2, %p174_p1 }
   0xa   :  { %p177_p4 = pnand %p176_p3, %p170_p0 }
  0x11   :  { %v164_v11 = vpop.eup %163 }
  0x12   :  { %v21_v12 = vmul.f32 0.6931472, %v164_v11  ;;  %v166_v15 = vpop.eup %165 }
  0x14   :  { %v27_v13 = vsel %vm26_vm1, %v24_v10, %v21_v12 }
  0x15   :  { %158 = vmatmul.mubr.msk.f32.vlgmr.msra.gmra.mxu0 %vm32_vm2, %v27_v13 }
  0xd5   :  { %v102_v16 = vpop.f32.mrf.mxu0 }
  0xd6   :  { %v114_v18 = vmul.f32 %v166_v15, %v102_v16 }
  0xd7   :  { %v159_v19 = vpop.f32.mrf.mxu0 }
  0xd8   :  { %v122_v20 = vadd.f32 %v143_v17, %v114_v18 }
  0xda   :  { %v123_v21 = vmul.f32 1.442695, %v122_v20 }
  0xdc   :  { %167 = vpow2.f32 %v123_v21 }
  0xe9   :  { %v168_v22 = vpop.eup %167 }
  0xea   :  { %126 = vst.msk [vmem:[#allocation2] sm:$0xff] %vm125_vm3, %v168_v22 }
  0xeb   :  { %180 = shalt.err (!%p177_p4)
}
  0xec   :  { %136 = dma.vmem_to_hbm [thread:$0]  %s134_s28, 128, %s247_s4, [#allocation3]  }
  0xed   :  { %189 = dma.done.wait [#allocation3], 128  }
  0xee   :  { %190 = vsyncadd [#allocation3], 4294967168 }
  0xef   :  { %140 = vsyncpa [#allocation3], 1 }

</bundles_post_ra>
